<compile_context>
chip_gen: v6e
topology: v6e:2x2x1
jax: 0.10.0
libtpu: 0.0.40
codegen_flags: <defaults>
</compile_context>

<pallas_src>
import math
import functools

import jax
import jax.numpy as jnp
from jax.experimental import pallas as pl
from jax.experimental.pallas import tpu as pltpu


def _pe_kernel(seed_ref, coef_ref, out_ref, *, g, p_drop, training):
    """Compute one (TR, W) folded tile of dropout(pe[:L])."""
    i = pl.program_id(0)
    tr, w = out_ref.shape

    cf = coef_ref[...]                  # (2, W) column-only coefficients
    div = cf[0:1, :]                    # div_term per folded lane
    off = cf[1:2, :]                    # sub_row*div_term + (col % 2) * pi/2

    # absolute folded-row index of every row in this tile
    row_idx = jax.lax.broadcasted_iota(jnp.int32, (tr, 1), 0) + i * tr
    # base sequence position of each folded row; per-lane sub-row offset is
    # already folded into `off`
    pos0 = row_idx.astype(jnp.float32) * jnp.float32(g)

    pe = jnp.sin(pos0 * div + off)      # cos(x) == sin(x + pi/2)

    if training and p_drop > 0.0:
        # TODO(synk): torch.nn.Dropout's RNG stream cannot be replicated
        # bit-exactly; use a deterministic counter-based hash (lowbias32) on the
        # absolute element index so the mask is independent of the tiling.
        seed_u = seed_ref[0].astype(jnp.uint32)
        lane_idx = jax.lax.broadcasted_iota(jnp.uint32, (1, w), 1)
        flat = row_idx.astype(jnp.uint32) * jnp.uint32(w) + lane_idx  # (tr, w)
        x = flat + seed_u
        x = x ^ (x >> 16)
        x = x * jnp.uint32(0x7FEB352D)
        x = x ^ (x >> 15)
        x = x * jnp.uint32(0x846CA68B)
        x = x ^ (x >> 16)
        thr = min(int(round(p_drop * 2.0 ** 32)), 2 ** 32 - 1)
        keep = x >= jnp.uint32(thr)     # P(keep) = 1 - p
        scale = jnp.float32(1.0 / (1.0 - p_drop))
        pe = jnp.where(keep, pe * scale, jnp.float32(0.0))

    out_ref[...] = pe


def positional_encoding(context_length, embedding_size, dropout_p, seed,
                        training=True, tile_bytes=2 * 1024 * 1024):
    """Returns dropout(pe[:context_length]) of shape (context_length, E), f32."""
    L = int(context_length)
    E = int(embedding_size)

    # ---- lane-dense folding: pack g sequence positions per 128-lane row
    if E % 128 == 0 or 128 % E != 0:
        g = 1
    else:
        g = 128 // E
    W = g * E

    # ---- row tiling of the folded (L_fold, W) table (~tile_bytes per block)
    L_fold = -(-L // g)
    max_rows = max(8, (tile_bytes // (W * 4)) // 8 * 8)
    if L_fold <= max_rows:
        TR = L_fold                     # single block (= full array dim, legal)
        L_fold_pad = L_fold
    else:
        TR = max_rows                   # multiple of 8
        L_fold_pad = -(-L_fold // TR) * TR
    grid = (L_fold_pad // TR,)

    # ---- column-only coefficients, computed once outside the kernel
    c = jnp.arange(E)
    k = (c // 2).astype(jnp.float32)
    div_term = jnp.exp(k * jnp.float32(-2.0 * math.log(10000.0) / E))
    phase = (c % 2).astype(jnp.float32) * jnp.float32(math.pi / 2.0)
    sub = (jnp.arange(W) // E).astype(jnp.float32)   # folded sub-row per lane
    div_w = jnp.tile(div_term, g)
    off_w = sub * div_w + jnp.tile(phase, g)
    coef = jnp.stack([div_w, off_w], axis=0).astype(jnp.float32)  # (2, W)

    seed_arr = jnp.asarray(seed, dtype=jnp.int32).reshape((1,))

    kernel = functools.partial(
        _pe_kernel, g=g, p_drop=float(dropout_p), training=bool(training))

    out_fold = pl.pallas_call(
        kernel,
        out_shape=jax.ShapeDtypeStruct((L_fold_pad, W), jnp.float32),
        grid=grid,
        in_specs=[
            pl.BlockSpec(memory_space=pltpu.SMEM),     # seed scalar
            pl.BlockSpec((2, W), lambda i: (0, 0)),    # column coefficients
        ],
        out_specs=pl.BlockSpec((TR, W), lambda i: (i, 0)),
        compiler_params=pltpu.CompilerParams(
            dimension_semantics=("parallel",),         # independent tiles
        ),
    )(seed_arr, coef)

    # free row-major unfold back to (L, E), drop padding
    return out_fold.reshape(L_fold_pad * g, E)[:L]


def _reference_pe(context_length, embedding_size):
    """Pure-JAX reference of the PyTorch buffer pe[:context_length]."""
    pos = jnp.arange(context_length, dtype=jnp.float32)[:, None]
    div = jnp.exp(
        jnp.arange(0, embedding_size, 2, dtype=jnp.float32)
        * (-math.log(10000.0) / embedding_size))
    ang = pos * div
    pe = jnp.zeros((context_length, embedding_size), jnp.float32)
    pe = pe.at[:, 0::2].set(jnp.sin(ang))
    pe = pe.at[:, 1::2].set(jnp.cos(ang))
    return pe


if __name__ == "__main__":
    embedding_size = 32
    dropout_p = 0.1
    context_length = 8

    # deterministic device-side seed (no host round-trip / sync)
    key = jax.random.PRNGKey(0)
    seed = jax.random.randint(key, (1,), 0, 2 ** 31 - 1, dtype=jnp.int32)

    # 1) eval mode (dropout = identity): must match the PyTorch pe table
    out_eval = jax.block_until_ready(
        positional_encoding(context_length, embedding_size, dropout_p, seed,
                            training=False))
    ref = _reference_pe(context_length, embedding_size)
    assert out_eval.shape == (context_length, embedding_size)
    assert jnp.allclose(out_eval, ref, atol=1e-5), "PE table mismatch (E=32)"

    # 2) eval mode, E = 128 (g = 1 path), L not a multiple of 8
    out128 = jax.block_until_ready(
        positional_encoding(24, 128, dropout_p, seed, training=False))
    assert jnp.allclose(out128, _reference_pe(24, 128), atol=1e-5), \
        "PE table mismatch (E=128)"

    # 3) eval mode, multi-tile path with row padding (tiny tile budget)
    out_multi = jax.block_until_ready(
        positional_encoding(40, 32, dropout_p, seed, training=False,
                            tile_bytes=4096))
    assert jnp.allclose(out_multi, _reference_pe(40, 32), atol=1e-5), \
        "PE table mismatch (multi-tile)"

    # 4) train mode: fused, deterministic, tiling-invariant dropout
    out_train = jax.block_until_ready(
        positional_encoding(context_length, embedding_size, dropout_p, seed,
                            training=True))
    assert out_train.shape == (context_length, embedding_size)
    kept = ref * jnp.float32(1.0 / (1.0 - dropout_p))
    ok = (out_train == 0.0) | jnp.isclose(out_train, kept, atol=1e-5)
    assert bool(jnp.all(ok)), "dropout output is not in {0, pe/(1-p)}"

    print("KERNEL_OK")
</pallas_src>

<mosaic_0001>
module attributes {stable_mosaic.version = 11 : i64} {
  func.func @_pe_kernel(%arg0: i32, %arg1: memref<1xi32, #tpu.memory_space<smem>>, %arg2: memref<2x128xf32, #tpu.memory_space<vmem>>, %arg3: memref<2x128xf32, #tpu.memory_space<vmem>>) attributes {dimension_semantics = [#tpu.dimension_semantics<parallel>], iteration_bounds = array<i64: 1>, scalar_prefetch = 0 : i64, scratch_operands = 0 : i64, tpu.core_type = #tpu.core_type<tc>, window_params = [{transform_indices = @transform_0, window_bounds = array<i64: 1>}, {pipeline_mode = #tpu.pipeline_mode<synchronous>, transform_indices = @transform_1, window_bounds = array<i64: 2, 128>}, {transform_indices = @transform_2, window_bounds = array<i64: 2, 128>}]} {
    %c0 = arith.constant 0 : index
    %c0_0 = arith.constant 0 : index
    %0 = vector.load %arg2[%c0, %c0_0] : memref<2x128xf32, #tpu.memory_space<vmem>>, vector<2x128xf32>
    %1 = vector.extract_strided_slice %0 {offsets = [0, 0], sizes = [1, 128], strides = [1, 1]} : vector<2x128xf32> to vector<1x128xf32>
    %2 = vector.extract_strided_slice %0 {offsets = [1, 0], sizes = [1, 128], strides = [1, 1]} : vector<2x128xf32> to vector<1x128xf32>
    %3 = tpu.iota {dimensions = array<i32: 0>} : vector<2x1xi32>
    %c2_i32 = arith.constant 2 : i32
    %4 = arith.muli %arg0, %c2_i32 : i32
    %5 = vector.broadcast %4 : i32 to vector<2x1xi32>
    %6 = arith.addi %3, %5 : vector<2x1xi32>
    %7 = arith.sitofp %6 : vector<2x1xi32> to vector<2x1xf32>
    %cst = arith.constant 4.000000e+00 : f32
    %8 = vector.broadcast %cst : f32 to vector<2x1xf32>
    %9 = arith.mulf %7, %8 : vector<2x1xf32>
    %10 = vector.broadcast %9 : vector<2x1xf32> to vector<2x128xf32>
    %11 = vector.broadcast %1 : vector<1x128xf32> to vector<2x128xf32>
    %12 = arith.mulf %10, %11 : vector<2x128xf32>
    %13 = vector.broadcast %2 : vector<1x128xf32> to vector<2x128xf32>
    %14 = arith.addf %12, %13 : vector<2x128xf32>
    %15 = math.sin %14 : vector<2x128xf32>
    %c0_1 = arith.constant 0 : index
    %c0_2 = arith.constant 0 : index
    %16 = vector.load %arg3[%c0_1, %c0_2] : memref<2x128xf32, #tpu.memory_space<vmem>>, vector<2x128xf32>
    tpu.vector_store %arg3[%c0_1, %c0_2], %15 {strides = array<i32>} : memref<2x128xf32, #tpu.memory_space<vmem>>, vector<2x128xf32>,
    return
  }
  func.func @transform_0(%arg0: i32) -> i32 {
    %c0_i32 = arith.constant 0 : i32
    %c0_i32_0 = arith.constant 0 : i32
    return %c0_i32 : i32
  }
  func.func @transform_1(%arg0: i32) -> (i32, i32) {
    %c0_i32 = arith.constant 0 : i32
    %c0_i32_0 = arith.constant 0 : i32
    %c0_i32_1 = arith.constant 0 : i32
    return %c0_i32, %c0_i32_0 : i32, i32
  }
  func.func @transform_2(%arg0: i32) -> (i32, i32) {
    %c0_i32 = arith.constant 0 : i32
    %c0_i32_0 = arith.constant 0 : i32
    return %arg0, %c0_i32 : i32, i32
  }
}

</mosaic_0001>

<bundles_post_ra>
// kernel: tpu_custom_call.1
= control target key start
LH: loop header
LB: loop body
LE: loop exit
PB: predicated region body
PF: predicated region fallthrough
CT: control target
= control target key end

     0   :  { %v14_v0 = vlaneseq  ;;  %s240_s0 = inlined_call_operand.<no memory space> [shape: s32[1], index: 0, kind: input, shape index: {}]   ;;  %s241_s1 = inlined_call_operand.vmem [shape: f32[2,128], index: 1, kind: input, shape index: {}]   ;;  %s242_s2 = inlined_call_operand.hbm [shape: f32[2,128], index: 2, kind: output, shape index: {}]  }
   0x2   :  { %v15_v1 = vshrl.u32 %v14_v0, 7 }
   0x3   :  { %8 = vsyncpa [#allocation4], 0  ;;  %v13_v2 = vld [vmem:[%s241_s1] sm:$0x3]  ;;  %v191_v22 = vmov 683565275  }
   0x4   :  { %v19_v3 = vcvt.s32.f32 %v15_v1  ;;  %v23_v4 = vsub.s32 0, %v15_v1  ;;  %v28_v5 = vsub.s32 1, %v15_v1  ;;  %v192_v24 = vmov 2475754826   ;;  %s197_s0 = smov [#allocation3]  }
   0x5   :  { %v193_v26 = vmov 2131351028   ;;  %v194_v28 = vmov 2102212464   ;;  %v195_v30 = vmov 920167782  }
   0x6   :  { %v20_v6 = vmul.f32 4.0, %v19_v3  ;;  %v24_v7 = vrot.slane %v13_v2, %v23_v4  ;;  %v29_v8 = vrot.slane %v13_v2, %v28_v5  ;;  %v196_v37 = vmov 1326507024   ;;  %s142_s1 = sshll.u32 %s197_s0, 4  ;;  %s143_s1 = int_to_ptr.vmem [resolvable:$true] %s142_s1 }
   0x7   :  { %s169_s11 = scalar_lea.vmem %s143_s1, 32  ;;  %p174_p1 = scmp.lt.s32.totalorder %s143_s1, %s143_s1 }
   0x8   :  { %v25_v9 = vmul.f32 %v24_v7, %v20_v6  ;;  %p170_p0 = scmp.ne.s32.totalorder %s143_s1, %s169_s11  ;;  %p175_p2 = scmp.lt.s32.totalorder %s169_s11, %s169_s11 }
   0xa   :  { %v216_v10 = vadd.f32 %v29_v8, %v25_v9  ;;  %p176_p3 = por %p175_p2, %p174_p1 }
   0xc   :  { %v34_v11 = vand.u32 2139095040, %v216_v10  ;;  %v31_v13 = vand.u32 2147483647, %v216_v10  ;;  %vm33_vm7 = vcmp.lt.s32.totalorder %v216_v10, 0  ;;  %vm123_vm12 = vweird.f32 %v216_v10  ;;  %p177_p4 = pnand %p176_p3, %p170_p0 }
   0xe   :  { %v35_v12 = vshrl.u32 %v34_v11, 23  ;;  %v38_v16 = vand.u32 8388607, %v31_v13  ;;  %vm32_vm8 = vcmp.le.f32.partialorder %v31_v13, 0.7853982 }
  0x10   :  { %v150_v14 = vadd.s32 4294967169, %v35_v12  ;;  %v39_v19 = vor.u32 8388608, %v38_v16 }
  0x12   :  { %v41_v15 = vadd.s32 1, %v150_v14  ;;  %v79_v39 = vshll.u32 %v39_v19, 8 }
  0x14   :  { %vm42_vm0 = vcmp.gt.s32.totalorder %v41_v15, 0 }
  0x15   :  { %v43_v17 = vsel %vm42_vm0, %v41_v15, 0 }
  0x16   :  { %v45_v18 = vand.u32 31, %v43_v17  ;;  %v44_v20 = vshrl.u32 %v43_v17, 5 }
  0x18   :  { %v46_v21 = vsub.s32 32, %v45_v18  ;;  %v48_v23 = vshll.u32 %v191_v22, %v45_v18  ;;  %v51_v25 = vshll.u32 %v192_v24, %v45_v18  ;;  %v54_v27 = vshll.u32 %v193_v26, %v45_v18 }
  0x19   :  { %v57_v29 = vshll.u32 %v194_v28, %v45_v18  ;;  %v60_v31 = vshll.u32 %v195_v30, %v45_v18  ;;  %vm63_vm1 = vcmp.lt.s32.totalorder %v44_v20, 1  ;;  %vm66_vm2 = vcmp.lt.s32.totalorder %v44_v20, 4 }
  0x1a   :  { %v47_v32 = vshrl.u32 %v191_v22, %v46_v21  ;;  %v49_v33 = vshrl.u32 %v192_v24, %v46_v21  ;;  %v52_v34 = vshrl.u32 %v193_v26, %v46_v21  ;;  %v55_v35 = vshrl.u32 %v194_v28, %v46_v21 }
  0x1b   :  { %v58_v36 = vshrl.u32 %v195_v30, %v46_v21  ;;  %v61_v38 = vshrl.u32 %v196_v37, %v46_v21  ;;  %vm64_vm3 = vcmp.lt.s32.totalorder %v44_v20, 2  ;;  %vm65_vm4 = vcmp.lt.s32.totalorder %v44_v20, 3 }
  0x1c   :  { %v50_v40 = vor.u32 %v49_v33, %v48_v23  ;;  %v53_v41 = vor.u32 %v52_v34, %v51_v25  ;;  %v56_v42 = vor.u32 %v55_v35, %v54_v27 }
  0x1d   :  { %v59_v43 = vor.u32 %v58_v36, %v57_v29  ;;  %v62_v44 = vor.u32 %v61_v38, %v60_v31 }
  0x1e   :  { %v67_v45 = vsel %vm63_vm1, %v47_v32, %v50_v40  ;;  %v68_v46 = vsel %vm66_vm2, %v56_v42, 2102212464  ;;  %v71_v47 = vsel %vm63_vm1, %v50_v40, %v53_v41  ;;  %v75_v48 = vsel %vm63_vm1, %v53_v41, %v56_v42 }
  0x1f   :  { %v69_v49 = vsel %vm65_vm4, %v53_v41, %v68_v46  ;;  %v72_v50 = vsel %vm66_vm2, %v59_v43, 920167782  ;;  %v76_v51 = vsel %vm66_vm2, %v62_v44, 1326507024 }
  0x20   :  { %v73_v52 = vsel %vm65_vm4, %v56_v42, %v72_v50  ;;  %v77_v53 = vsel %vm65_vm4, %v59_v43, %v76_v51  ;;  %v70_v54 = vsel %vm64_vm3, %v67_v45, %v69_v49 }
  0x21   :  { %v74_v55 = vsel %vm64_vm3, %v71_v47, %v73_v52  ;;  %v78_v56 = vsel %vm64_vm3, %v75_v48, %v77_v53  ;;  %v86_v61 = vmul.u32 %v79_v39, %v70_v54 }
  0x22   :  { %v222_v57 = vmul.u32.u64.low %v79_v39, %v78_v56  ;;  %v223_v58 = vmul.u32.u64.high %v79_v39, %v78_v56, %v222_v57  ;;  %v225_v59 = vmul.u32.u64.low %v79_v39, %v74_v55  ;;  %v226_v60 = vmul.u32.u64.high %v79_v39, %v74_v55, %v225_v59 }
  0x24   :  { %vm88_vm5 = vc.u32 %v223_v58, %v225_v59  ;;  %v89_v62 = vadd.s32 1, %v226_v60  ;;  %v87_v9 = vadd.s32 %v225_v59, %v223_v58 }
  0x26   :  { %v90_v63 = vsel %vm88_vm5, %v89_v62, %v226_v60 }
  0x27   :  { %v91_v0 = vadd.s32 %v90_v63, %v86_v61 }
  0x29   :  { %v92_v1 = vadd.s32 536870912, %v91_v0 }
  0x2b   :  { %v93_v2 = vshrl.u32 %v92_v1, 30 }
  0x2d   :  { %v94_v3 = vshll.u32 %v93_v2, 30  ;;  %v117_v24 = vsub.s32 4, %v93_v2 }
  0x2f   :  { %v95_v4 = vsub.s32 %v91_v0, %v94_v3  ;;  %v118_v27 = vsel %vm33_vm7, %v117_v24, %v93_v2 }
  0x30   :  { %v120_v29 = vsel %vm32_vm8, 0, %v118_v27 }
  0x31   :  { %v97_v5 = vsub.s32 0, %v95_v4  ;;  %v124_v30 = vadd.s32 3, %v120_v29 }
  0x33   :  { %v151_v6 = vmin.u32 %v97_v5, %v95_v4  ;;  %v125_v31 = vand.u32 3, %v124_v30 }
  0x35   :  { %v99_v7 = vclz %v151_v6  ;;  %vm130_vm9 = vcmp.eq.s32.totalorder %v125_v31, 2  ;;  %vm127_vm10 = vcmp.eq.s32.totalorder %v125_v31, 0  ;;  %vm126_vm11 = vcmp.lt.s32.totalorder %v125_v31, 2 }
  0x37   :  { %v152_v8 = vadd.s32 4294967294, %v99_v7 }
  0x39   :  { %vm153_vm6 = vcmp.lt.s32.totalorder %v152_v8, 0 }
  0x3a   :  { %v102_v11 = vsel %vm153_vm6, 0, %v152_v8 }
  0x3b   :  { %v103_v12 = vsub.s32 32, %v102_v11  ;;  %v104_v14 = vshll.u32 %v95_v4, %v102_v11  ;;  %v107_v15 = vsub.s32 4294967266, %v102_v11 }
  0x3d   :  { %v105_v16 = vshrl.u32 %v87_v9, %v103_v12  ;;  %v108_v17 = vadd.s32 127, %v107_v15 }
  0x3f   :  { %v106_v18 = vor.u32 %v105_v16, %v104_v14  ;;  %v109_v19 = vshll.u32 %v108_v17, 23 }
  0x41   :  { %v110_v20 = vor.u32 4788187, %v109_v19  ;;  %v113_v21 = vcvt.s32.f32 %v106_v18 }
  0x43   :  { %v111_v22 = vand.u32 2147483647, %v110_v20 }
  0x45   :  { %v114_v23 = vmul.f32 %v113_v21, %v111_v22 }
  0x47   :  { %v115_v25 = vxor.u32 2147483648, %v114_v23 }
  0x49   :  { %v116_v26 = vsel %vm33_vm7, %v115_v25, %v114_v23 }
  0x4a   :  { %v119_v28 = vsel %vm32_vm8, %v216_v10, %v116_v26 }
  0x4b   :  { %165 = vcosq.f32 %v119_v28 }
  0x4c   :  { %167 = vsinq.f32 %v119_v28 }
  0x58   :  { %v166_v32 = vpop.eup %165 }
  0x59   :  { %v168_v33 = vpop.eup %167  ;;  %v131_v34 = vxor.u32 2147483648, %v166_v32 }
  0x5a   :  { %v128_v35 = vxor.u32 2147483648, %v168_v33 }
  0x5b   :  { %v132_v13 = vsel %vm130_vm9, %v131_v34, %v168_v33 }
  0x5c   :  { %v129_v36 = vsel %vm127_vm10, %v166_v32, %v128_v35 }
  0x5d   :  { %v133_v37 = vsel %vm126_vm11, %v129_v36, %v132_v13 }
  0x5e   :  { %v134_v38 = vsel %vm123_vm12, nan, %v133_v37 }
  0x5f   :  { %135 = vst [vmem:[#allocation3] sm:$0x3] %v134_v38 }
  0x60   :  { %180 = shalt.err (!%p177_p4)
}
  0x61   :  { %145 = dma.vmem_to_hbm [thread:$0]  %s143_s1, 32, %s242_s2, [#allocation4]  }
  0x62   :  { %189 = dma.done.wait [#allocation4], 32  }
  0x63   :  { %190 = vsyncadd [#allocation4], 4294967264 }
  0x64   :  { %149 = vsyncpa [#allocation4], 1 }

</bundles_post_ra>
